<compile_context>
chip_gen: v6e
topology: v6e:2x2x1
jax: 0.10.0
libtpu: 0.0.40
codegen_flags: <defaults>
</compile_context>

<pallas_src>
import functools

import jax
import jax.numpy as jnp
from jax import lax
from jax.experimental import pallas as pl
from jax.experimental.pallas import tpu as pltpu

LEAKY_SLOPE = 0.01   # nn.LeakyReLU default negative_slope
GN_EPS = 1e-5        # nn.GroupNorm default eps


def _default_vmem_limit_bytes():
    # 96 MiB on 128-MiB chips (v5e/v6e), ~48 MiB on v7x (64 MiB physical).
    try:
        cap = pltpu.get_tpu_info().vmem_capacity_bytes
    except Exception:
        cap = 64 * 1024 * 1024
    return int(min(96 * 1024 * 1024, cap * 3 // 4))


_VMEM_LIMIT_BYTES = _default_vmem_limit_bytes()


def _convblock_kernel(x_ref, w_ref, gamma_ref, beta_ref, vmask_ref, out_ref, *, H, W):
    """Processes `Bb` samples per grid step.

    x_ref     : (Bb, Cin, Lpad)  bf16 zero-padded samples, (H+3)x(W+2) spatial on lanes
    w_ref     : (Cout, 9*Cin)    bf16 conv taps, column = (dy*3+dx)*Cin + cin
    gamma_ref : (Cout, 1)        f32 GN weight * channel mask (folded in wrapper)
    beta_ref  : (Cout, 1)        f32 GN bias   * channel mask
    vmask_ref : (1, L)           f32: 1.0 on the H*W valid columns, 0.0 on wrap cols
    out_ref   : (Bb, Cout, L)    f32 lane-dense output (wrap columns dropped in wrapper)
    """
    Wp = W + 2
    L = H * Wp
    Bb = out_ref.shape[0]
    cout = out_ref.shape[1]
    n = float(cout * H * W)            # GroupNorm(1, C) statistics over (C, H, W)

    w = w_ref[...]                     # resident, reused across the Bb samples
    gamma = gamma_ref[...]
    beta = beta_ref[...]
    vmask = vmask_ref[...]

    for i in range(Bb):                # Bb is a small static constant (<= 8)
        x = x_ref[i]                   # (Cin, Lpad) bf16

        # 3x3 conv as ONE MXU matmul: stack the 9 statically lane-shifted views
        # along sublanes (each shifted copy is built exactly once).
        taps = [x[:, dy * Wp + dx: dy * Wp + dx + L]
                for dy in range(3) for dx in range(3)]
        xcat = jnp.concatenate(taps, axis=0)                       # (9*Cin, L) bf16
        y = jnp.dot(w, xcat, preferred_element_type=jnp.float32)   # (Cout, L) f32

        # LeakyReLU, then zero the 2 row-wrap columns per spatial row so the
        # GN statistics only see the H*W valid positions.
        y = jnp.where(y >= 0, y, LEAKY_SLOPE * y)
        y = y * vmask

        # GroupNorm(num_groups=1): one-pass mean / E[x^2] in f32.
        # TODO(synk): switch to two-pass (mean-subtracted) variance if the
        # activation mean ever gets large enough for cancellation to matter.
        s1 = jnp.sum(y)
        s2 = jnp.sum(y * y)
        mean = s1 / n
        var = jnp.maximum(s2 / n - mean * mean, 0.0)   # biased variance (PyTorch GN)
        inv = lax.rsqrt(var + GN_EPS)

        # Fused normalize + affine (+ channel mask): yn = y*a + b.
        a = gamma * inv                                # (Cout, 1)
        b = beta - mean * a                            # (Cout, 1)
        out_ref[i] = (y * a + b).astype(out_ref.dtype)  # ONE lane-dense store


def _pick_samples_per_step(batch):
    # Largest power-of-two divisor of `batch` (<= 8) that still leaves >= 2
    # grid steps (two v7x TensorCores share the parallel grid axis).
    for bb in (8, 4, 2):
        if batch % bb == 0 and batch // bb >= 2:
            return bb
    return 1


@functools.partial(jax.jit, static_argnames=("samples_per_step",))
def conv_block_forward(x, weight, gamma, beta, mask=None, *, samples_per_step=None):
    """
    x      : (B, Cin, H, W)    NCHW
    weight : (Cout, Cin, 3, 3) conv3x3 weight (bias=False)
    gamma  : (Cout,)           GroupNorm affine weight
    beta   : (Cout,)           GroupNorm affine bias
    mask   : (Cout,) or None   binary channel mask
    returns: (B, Cout, H, W)
    """
    B, Cin, H, W = x.shape
    Cout = weight.shape[0]
    Wp = W + 2
    L = H * Wp
    Lpad = (H + 3) * Wp

    Bb = samples_per_step if samples_per_step is not None else _pick_samples_per_step(B)
    assert B % Bb == 0, "samples_per_step must divide the batch size"

    # Zero-pad spatially (one extra bottom row keeps every tap's length-L lane
    # slice in bounds) and flatten the spatial dims onto the lane axis; NCHW
    # is preserved end-to-end (no wrapper transpose, no im2col in HBM).
    # bf16 operands halve DMA bytes and give ~2-3x MXU throughput; the conv
    # accumulation and all GroupNorm math stay f32 inside the kernel.
    # TODO(synk): for memory-bound production sizes, move the zero-padding
    # in-kernel (memory_space=pl.ANY + DMA into a zero-initialised VMEM
    # scratch) to avoid the extra HBM write+read of the padded input.
    xflat = jnp.pad(x, ((0, 0), (0, 0), (1, 2), (1, 1)))
    xflat = xflat.reshape(B, Cin, Lpad).astype(jnp.bfloat16)

    # Taps flattened to (Cout, 9*Cin), column index = (dy*3+dx)*Cin + cin,
    # matching the in-kernel (9*Cin, L) sublane concat.
    w9 = weight.transpose(0, 2, 3, 1).reshape(Cout, 9 * Cin).astype(jnp.bfloat16)

    # Fold the binary channel mask into the GN affine parameters
    # (mask * (gamma*xhat + beta) == (gamma*mask)*xhat + (beta*mask)).
    if mask is not None:
        gamma = gamma * mask
        beta = beta * mask
    gamma_eff = gamma.reshape(Cout, 1).astype(jnp.float32)
    beta_eff = beta.reshape(Cout, 1).astype(jnp.float32)

    # 1.0 on valid flattened columns, 0.0 on the 2 row-wrap columns per row.
    vmask = ((jnp.arange(L) % Wp) < W).astype(jnp.float32).reshape(1, L)

    # TODO(synk): for very large Cout*H*W (v7x's 64 MiB VMEM) add an
    # "arbitrary" spatial grid axis with a 1-row halo and two-phase GroupNorm
    # (accumulate s1/s2 across tiles in scratch, normalize in a second sweep).
    kernel = functools.partial(_convblock_kernel, H=H, W=W)
    out = pl.pallas_call(
        kernel,
        out_shape=jax.ShapeDtypeStruct((B, Cout, L), jnp.float32),
        grid_spec=pltpu.PrefetchScalarGridSpec(
            num_scalar_prefetch=0,
            grid=(B // Bb,),
            in_specs=[
                pl.BlockSpec((Bb, Cin, Lpad), lambda b: (b, 0, 0)),
                pl.BlockSpec((Cout, 9 * Cin), lambda b: (0, 0)),
                pl.BlockSpec((Cout, 1), lambda b: (0, 0)),
                pl.BlockSpec((Cout, 1), lambda b: (0, 0)),
                pl.BlockSpec((1, L), lambda b: (0, 0)),
            ],
            out_specs=pl.BlockSpec((Bb, Cout, L), lambda b: (b, 0, 0)),
        ),
        compiler_params=pltpu.CompilerParams(
            dimension_semantics=("parallel",),      # samples spread over both v7x TCs
            vmem_limit_bytes=_VMEM_LIMIT_BYTES,
        ),
    )(xflat, w9, gamma_eff, beta_eff, vmask)

    # (B, Cout, H*Wp) -> (B, Cout, H, Wp) is a free reshape; dropping the two
    # wrap columns is a cheap slice that XLA fuses into the consumer.
    return out.reshape(B, Cout, H, Wp)[..., :W]


def _reference(x, weight, gamma, beta, mask):
    """Pure-JAX reference mirroring the PyTorch forward (eval mode, f32)."""
    y = lax.conv_general_dilated(
        x, weight, window_strides=(1, 1), padding=((1, 1), (1, 1)),
        dimension_numbers=("NCHW", "OIHW", "NCHW"))
    y = jnp.where(y >= 0, y, LEAKY_SLOPE * y)
    mean = jnp.mean(y, axis=(1, 2, 3), keepdims=True)
    var = jnp.mean((y - mean) ** 2, axis=(1, 2, 3), keepdims=True)
    y = (y - mean) * lax.rsqrt(var + GN_EPS)
    y = y * gamma.reshape(1, -1, 1, 1) + beta.reshape(1, -1, 1, 1)
    if mask is not None:
        y = y * mask.reshape(1, -1, 1, 1)
    return y


if __name__ == "__main__":
    key = jax.random.PRNGKey(0)
    kx, kw, kg, kb, km = jax.random.split(key, 5)

    def make_inputs(B, Cin, Cout, H, W):
        x = jax.random.normal(kx, (B, Cin, H, W), dtype=jnp.float32)
        fan_in = Cin * 3 * 3
        weight = jax.random.normal(kw, (Cout, Cin, 3, 3), dtype=jnp.float32) / jnp.sqrt(fan_in)
        gamma = 1.0 + 0.1 * jax.random.normal(kg, (Cout,), dtype=jnp.float32)
        beta = 0.1 * jax.random.normal(kb, (Cout,), dtype=jnp.float32)
        mask = (jax.random.uniform(km, (Cout,)) > 0.3).astype(jnp.float32)
        return x, weight, gamma, beta, mask

    # bf16 matmul operands (f32 accumulation) => bf16-level tolerance vs f32 ref.
    TOL = dict(atol=2e-2, rtol=2e-2)

    # Case 1: B=2 -> one sample per grid step (2 parallel steps, both v7x TCs).
    args = make_inputs(2, 4, 8, 16, 16)
    out = jax.block_until_ready(conv_block_forward(*args))
    assert out.shape == (2, 8, 16, 16)
    assert jnp.allclose(out, _reference(*args), **TOL)

    # Case 2: B=8 -> exercises the multi-sample-per-step (Bb=4) path.
    args = make_inputs(8, 4, 8, 16, 16)
    out = jax.block_until_ready(conv_block_forward(*args))
    assert out.shape == (8, 8, 16, 16)
    assert jnp.allclose(out, _reference(*args), **TOL)

    print("KERNEL_OK")
</pallas_src>

<mosaic_0001>
module attributes {stable_mosaic.version = 11 : i64} {
  func.func @_convblock_kernel(%arg0: i32, %arg1: memref<1x4x342xbf16, #tpu.memory_space<vmem>>, %arg2: memref<8x36xbf16, #tpu.memory_space<vmem>>, %arg3: memref<8x1xf32, #tpu.memory_space<vmem>>, %arg4: memref<8x1xf32, #tpu.memory_space<vmem>>, %arg5: memref<1x288xf32, #tpu.memory_space<vmem>>, %arg6: memref<1x8x288xf32, #tpu.memory_space<vmem>>) attributes {dimension_semantics = [#tpu.dimension_semantics<parallel>], iteration_bounds = array<i64: 2>, scalar_prefetch = 0 : i64, scratch_operands = 0 : i64, tpu.core_type = #tpu.core_type<tc>, window_params = [{transform_indices = @transform_0, window_bounds = array<i64: 1, 4, 342>}, {pipeline_mode = #tpu.pipeline_mode<synchronous>, transform_indices = @transform_1, window_bounds = array<i64: 8, 36>}, {pipeline_mode = #tpu.pipeline_mode<synchronous>, transform_indices = @transform_2, window_bounds = array<i64: 8, 1>}, {pipeline_mode = #tpu.pipeline_mode<synchronous>, transform_indices = @transform_3, window_bounds = array<i64: 8, 1>}, {pipeline_mode = #tpu.pipeline_mode<synchronous>, transform_indices = @transform_4, window_bounds = array<i64: 1, 288>}, {transform_indices = @transform_5, window_bounds = array<i64: 1, 8, 288>}]} {
    %c0 = arith.constant 0 : index
    %c0_0 = arith.constant 0 : index
    %0 = vector.load %arg2[%c0, %c0_0] : memref<8x36xbf16, #tpu.memory_space<vmem>>, vector<8x36xbf16>
    %c0_1 = arith.constant 0 : index
    %c0_2 = arith.constant 0 : index
    %1 = vector.load %arg3[%c0_1, %c0_2] : memref<8x1xf32, #tpu.memory_space<vmem>>, vector<8x1xf32>
    %c0_3 = arith.constant 0 : index
    %c0_4 = arith.constant 0 : index
    %2 = vector.load %arg4[%c0_3, %c0_4] : memref<8x1xf32, #tpu.memory_space<vmem>>, vector<8x1xf32>
    %c0_5 = arith.constant 0 : index
    %c0_6 = arith.constant 0 : index
    %3 = vector.load %arg5[%c0_5, %c0_6] : memref<1x288xf32, #tpu.memory_space<vmem>>, vector<1x288xf32>
    %c0_7 = arith.constant 0 : index
    %c0_8 = arith.constant 0 : index
    %c0_9 = arith.constant 0 : index
    %4 = vector.load %arg1[%c0_7, %c0_8, %c0_9] : memref<1x4x342xbf16, #tpu.memory_space<vmem>>, vector<1x4x342xbf16>
    %5 = vector.shape_cast %4 : vector<1x4x342xbf16> to vector<4x342xbf16>
    %6 = vector.extract_strided_slice %5 {offsets = [0, 0], sizes = [4, 288], strides = [1, 1]} : vector<4x342xbf16> to vector<4x288xbf16>
    %7 = vector.extract_strided_slice %5 {offsets = [0, 1], sizes = [4, 288], strides = [1, 1]} : vector<4x342xbf16> to vector<4x288xbf16>
    %8 = vector.extract_strided_slice %5 {offsets = [0, 2], sizes = [4, 288], strides = [1, 1]} : vector<4x342xbf16> to vector<4x288xbf16>
    %9 = vector.extract_strided_slice %5 {offsets = [0, 18], sizes = [4, 288], strides = [1, 1]} : vector<4x342xbf16> to vector<4x288xbf16>
    %10 = vector.extract_strided_slice %5 {offsets = [0, 19], sizes = [4, 288], strides = [1, 1]} : vector<4x342xbf16> to vector<4x288xbf16>
    %11 = vector.extract_strided_slice %5 {offsets = [0, 20], sizes = [4, 288], strides = [1, 1]} : vector<4x342xbf16> to vector<4x288xbf16>
    %12 = vector.extract_strided_slice %5 {offsets = [0, 36], sizes = [4, 288], strides = [1, 1]} : vector<4x342xbf16> to vector<4x288xbf16>
    %13 = vector.extract_strided_slice %5 {offsets = [0, 37], sizes = [4, 288], strides = [1, 1]} : vector<4x342xbf16> to vector<4x288xbf16>
    %14 = vector.extract_strided_slice %5 {offsets = [0, 38], sizes = [4, 288], strides = [1, 1]} : vector<4x342xbf16> to vector<4x288xbf16>
    %15 = tpu.concatenate %6, %7, %8, %9, %10, %11, %12, %13, %14 in 0 : vector<4x288xbf16>, vector<4x288xbf16>, vector<4x288xbf16>, vector<4x288xbf16>, vector<4x288xbf16>, vector<4x288xbf16>, vector<4x288xbf16>, vector<4x288xbf16>, vector<4x288xbf16> -> vector<36x288xbf16>
    %cst = arith.constant dense<0.000000e+00> : vector<8x288xf32>
    %16 = tpu.matmul %0, %15, %cst {dimension_numbers = #tpu.dot_dimension_numbers<[1], [0], [0], [1], [0, 0, 1, 1], [], []>} : vector<8x36xbf16>, vector<36x288xbf16>, vector<8x288xf32> -> vector<8x288xf32>
    %cst_10 = arith.constant 0.000000e+00 : f32
    %17 = vector.broadcast %cst_10 : f32 to vector<8x288xf32>
    %18 = arith.cmpf oge, %16, %17 : vector<8x288xf32>
    %cst_11 = arith.constant 0.00999999977 : f32
    %19 = vector.broadcast %cst_11 : f32 to vector<8x288xf32>
    %20 = arith.mulf %19, %16 : vector<8x288xf32>
    %21 = arith.select %18, %16, %20 : vector<8x288xi1>, vector<8x288xf32>
    %22 = vector.broadcast %3 : vector<1x288xf32> to vector<8x288xf32>
    %23 = arith.mulf %21, %22 : vector<8x288xf32>
    %24 = vector.shape_cast %23 : vector<8x288xf32> to vector<1x8x288xf32>
    %cst_12 = arith.constant dense<0.000000e+00> : vector<1xf32>
    %25 = vector.multi_reduction <add>, %24, %cst_12 [1, 2] : vector<1x8x288xf32> to vector<1xf32>
    %26 = vector.shape_cast %25 : vector<1xf32> to vector<1x1x1xf32>
    %27 = vector.extract %26[0, 0, 0] : f32 from vector<1x1x1xf32>
    %28 = arith.mulf %23, %23 : vector<8x288xf32>
    %29 = vector.shape_cast %28 : vector<8x288xf32> to vector<1x8x288xf32>
    %cst_13 = arith.constant dense<0.000000e+00> : vector<1xf32>
    %30 = vector.multi_reduction <add>, %29, %cst_13 [1, 2] : vector<1x8x288xf32> to vector<1xf32>
    %31 = vector.shape_cast %30 : vector<1xf32> to vector<1x1x1xf32>
    %32 = vector.extract %31[0, 0, 0] : f32 from vector<1x1x1xf32>
    %cst_14 = arith.constant 2.048000e+03 : f32
    %33 = arith.divf %27, %cst_14 : f32
    %cst_15 = arith.constant 2.048000e+03 : f32
    %34 = arith.divf %32, %cst_15 : f32
    %35 = arith.mulf %33, %33 : f32
    %36 = arith.subf %34, %35 : f32
    %cst_16 = arith.constant 0.000000e+00 : f32
    %37 = arith.maximumf %36, %cst_16 : f32
    %cst_17 = arith.constant 9.99999974E-6 : f32
    %38 = arith.addf %37, %cst_17 : f32
    %39 = math.rsqrt %38 : f32
    %40 = vector.broadcast %39 : f32 to vector<8x1xf32>
    %41 = arith.mulf %1, %40 : vector<8x1xf32>
    %42 = vector.broadcast %33 : f32 to vector<8x1xf32>
    %43 = arith.mulf %42, %41 : vector<8x1xf32>
    %44 = arith.subf %2, %43 : vector<8x1xf32>
    %45 = vector.broadcast %41 : vector<8x1xf32> to vector<8x288xf32>
    %46 = arith.mulf %23, %45 : vector<8x288xf32>
    %47 = vector.broadcast %44 : vector<8x1xf32> to vector<8x288xf32>
    %48 = arith.addf %46, %47 : vector<8x288xf32>
    %c0_18 = arith.constant 0 : index
    %c0_19 = arith.constant 0 : index
    %c0_20 = arith.constant 0 : index
    %49 = vector.load %arg6[%c0_18, %c0_19, %c0_20] : memref<1x8x288xf32, #tpu.memory_space<vmem>>, vector<1x8x288xf32>
    %50 = vector.shape_cast %49 : vector<1x8x288xf32> to vector<8x288xf32>
    %51 = vector.shape_cast %48 : vector<8x288xf32> to vector<1x8x288xf32>
    tpu.vector_store %arg6[%c0_18, %c0_19, %c0_20], %51 {strides = array<i32>} : memref<1x8x288xf32, #tpu.memory_space<vmem>>, vector<1x8x288xf32>,
    return
  }
  func.func @transform_0(%arg0: i32) -> (i32, i32, i32) {
    %c0_i32 = arith.constant 0 : i32
    %c0_i32_0 = arith.constant 0 : i32
    %c0_i32_1 = arith.constant 0 : i32
    return %arg0, %c0_i32, %c0_i32_0 : i32, i32, i32
  }
  func.func @transform_1(%arg0: i32) -> (i32, i32) {
    %c0_i32 = arith.constant 0 : i32
    %c0_i32_0 = arith.constant 0 : i32
    %c0_i32_1 = arith.constant 0 : i32
    return %c0_i32, %c0_i32_0 : i32, i32
  }
  func.func @transform_2(%arg0: i32) -> (i32, i32) {
    %c0_i32 = arith.constant 0 : i32
    %c0_i32_0 = arith.constant 0 : i32
    %c0_i32_1 = arith.constant 0 : i32
    return %c0_i32, %c0_i32_0 : i32, i32
  }
  func.func @transform_3(%arg0: i32) -> (i32, i32) {
    %c0_i32 = arith.constant 0 : i32
    %c0_i32_0 = arith.constant 0 : i32
    %c0_i32_1 = arith.constant 0 : i32
    return %c0_i32, %c0_i32_0 : i32, i32
  }
  func.func @transform_4(%arg0: i32) -> (i32, i32) {
    %c0_i32 = arith.constant 0 : i32
    %c0_i32_0 = arith.constant 0 : i32
    %c0_i32_1 = arith.constant 0 : i32
    return %c0_i32, %c0_i32_0 : i32, i32
  }
  func.func @transform_5(%arg0: i32) -> (i32, i32, i32) {
    %c0_i32 = arith.constant 0 : i32
    %c0_i32_0 = arith.constant 0 : i32
    %c0_i32_1 = arith.constant 0 : i32
    return %arg0, %c0_i32, %c0_i32_0 : i32, i32, i32
  }
}

</mosaic_0001>

<bundles_post_ra>
// kernel: conv_block_forward.1
= control target key start
LH: loop header
LB: loop body
LE: loop exit
PB: predicated region body
PF: predicated region fallthrough
CT: control target
= control target key end

     0   :  { %s737_s18 = smov 0   ;;  %s843_s0 = inlined_call_operand.vmem [shape: bf16[2,4,342], index: 0, kind: input, shape index: {}]   ;;  %s844_s1 = inlined_call_operand.vmem [shape: bf16[8,36], index: 1, kind: input, shape index: {}]   ;;  %s845_s2 = inlined_call_operand.vmem [shape: f32[8,1], index: 2, kind: input, shape index: {}]   ;;  %s846_s3 = inlined_call_operand.vmem [shape: f32[8,1], index: 3, kind: input, shape index: {}]   ;;  %s847_s4 = inlined_call_operand.vmem [shape: f32[1,288], index: 4, kind: input, shape index: {}]   ;;  %s848_s5 = inlined_call_operand.vmem [shape: f32[2,8,288], index: 5, kind: output, shape index: {}]  }
   0x1 LB: > { %s625_s19 = sadd.s32 4294967295, %s692_s18   ;;  %p629_p0 = scmp.ge.s32.totalorder %s692_s18, 1  ;;  %s692_s18 = sphi %s737_s18, %s15_s18  }
   0x2   : > { %p187_p1 = scmp.lt.s32.totalorder %s692_s18, 3 }
   0x4   : > { %p188_p2 = pnand %p629_p0, %p187_p1 }
   0x5   : > { %p215_p3 = scmp.lt.s32.totalorder (!%p188_p2), %s625_s19, 1  ;;  %s696_s24 = smov (!%p188_p2), 109  }
   0x6   : > { %191 = sbr.rel (%p188_p2) target bundleno = 799 (0x31f), region = 40  ;;  %s697_s25 = smov (!%p188_p2), 90  }
   0x7   : > { %s698_s26 = smov (!%p188_p2), 108   ;;  %s699_s27 = smov (!%p188_p2), 92  }
   0x8   : > { %s700_s28 = smov (!%p188_p2), 91   ;;  %s701_s29 = smov (!%p188_p2), 127  }
   0x9   : > { %s703_s30 = smov (!%p188_p2), 126   ;;  %s705_s6 = smov (!%p188_p2), 110  }
   0xa   : > { %s706_s17 = smov (!%p188_p2), 0.0  }
   0xb   : > { %v236_v0 = vlaneseq  ;;  %v694_v1 = vmov 1983009808   ;;  %v695_v3 = vmov 0.0   ;;  %s850_s19 = smov (!%p215_p3, %s625_s19), 1  ;;  %vm702_vm0 = vmmov 0  }
   0xc   : > { %v234_v2 = vunpack.c.l.s4 %v694_v1  ;;  %641 = vmatprep.subr.bf16.mxu1 %v695_v3  ;;  %s651_s20 = smul.u32 6, %s850_s19  ;;  %647 = vmatprep.mubr.msk.bf16.mxu1 %vm702_vm0, %v695_v3  ;;  %v704_v18 = vmov 0   ;;  %vm332_vm1 = vcmask 1041408   ;;  %vm329_vm2 = vcmask 736256  }
   0xd   : > { %v748_v4 = vshrl.u32 %v236_v0, 7  ;;  %428 = vmatprep.mubr.bf16.mxu0 %v704_v18  ;;  %680 = vset.pattern.permute.xlu0 %v704_v18  ;;  %vm302_vm3 = vcmask 883712   ;;  %vm311_vm4 = vcmask 752640   ;;  %vm293_vm5 = vcmask 891904  }
   0xe   : > { %v235_v5 = vunpack.c.0.s8 %v234_v2  ;;  %s219_s23 = scalar_lea.vmem %s843_s0, %s651_s20  ;;  %681 = vset.pattern.permute.xlu1 %v704_v18  ;;  %vm342_vm6 = vcmask 1043456   ;;  %vm320_vm7 = vcmask 744448   ;;  %vm349_vm8 = vcmask 1045504   ;;  %v229_v18 = vld [vmem:[%s847_s4] sm:$0x7] }
   0xf   : > { %v230_v7 = vld [vmem:[%s219_s23] sm:$0x3f]  ;;  %vm263_vm9 = vcmask 1039360   ;;  %vm274_vm10 = vcmask 1031168   ;;  %vm284_vm11 = vcmask 900096   ;;  %vm383_vm12 = vcmask 293888  }
  0x10   : > { %v238_v6 = vsub.s32 %v235_v5, %v748_v4  ;;  %v232_v9 = vcombine.high %v230_v7, %v230_v7  ;;  %v248_v11 = vcombine.low %v230_v7, %v230_v7  ;;  %vm506_vm0 = vcmask 261120  }
  0x12   : > { %v755_v8 = vrot.slane %v230_v7, %v238_v6  ;;  %v759_v10 = vrot.slane %v232_v9, %v238_v6  ;;  %v255_v13 = vrot.slane %v248_v11, %v238_v6 }
  0x14   : > { %287 = vrot.lane.b32.xlu1 %v755_v8, %s696_s24  ;;  %323 = vrot.lane.b32.xlu0 %v755_v8, %s697_s25  ;;  %v765_v12 = vcombine.high %v755_v8, %v755_v8  ;;  %v256_v14 = vcombine.high %v255_v13, %v255_v13  ;;  %v266_v15 = vcombine.low %v755_v8, %v755_v8 }
  0x15   : > { %v267_v16 = vcombine.low %v759_v10, %v759_v10  ;;  %v277_v17 = vcombine.low %v255_v13, %v255_v13 }
  0x18   : > { %300 = vrot.lane.b32.xlu0 %v755_v8, %s698_s26  ;;  %327 = vrot.lane.b32.xlu1 %v759_v10, %s697_s25 }
  0x1c   : > { %325 = vrot.lane.b32.xlu0 %v765_v12, %s697_s25  ;;  %289 = vrot.lane.b32.xlu1 %v765_v12, %s696_s24 }
  0x20   : > { %291 = vrot.lane.b32.xlu0 %v759_v10, %s696_s24  ;;  %298 = vrot.lane.b32.xlu1 %v256_v14, %s698_s26 }
  0x24   : > { %296 = vrot.lane.b32.xlu0 %v255_v13, %s698_s26  ;;  %307 = vrot.lane.b32.xlu1 %v755_v8, %s699_s27 }
  0x28   : > { %305 = vrot.lane.b32.xlu1 %v266_v15, %s699_s27  ;;  %309 = vrot.lane.b32.xlu0 %v267_v16, %s699_s27  ;;  %s652_s27 = smul.u32 24, %s850_s19 }
  0x2c   : > { %318 = vrot.lane.b32.xlu1 %v266_v15, %s700_s28  ;;  %316 = vrot.lane.b32.xlu0 %v255_v13, %s700_s28 }
  0x30   : > { %259 = vrot.lane.b32.xlu1 %v256_v14, %s701_s29  ;;  %314 = vrot.lane.b32.xlu0 %v277_v17, %s700_s28 }
  0x34   : > { %257 = vrot.lane.b32.xlu1 %v255_v13, %s701_s29  ;;  %261 = vrot.lane.b32.xlu0 %v755_v8, %s701_s29 }
  0x38   : > { %272 = vrot.lane.b32.xlu1 %v267_v16, %s703_s30  ;;  %270 = vrot.lane.b32.xlu0 %v755_v8, %s703_s30 }
  0x3c   : > { %280 = vrot.lane.b32.xlu1 %v255_v13, %s705_s6  ;;  %268 = vrot.lane.b32.xlu0 %v266_v15, %s703_s30  ;;  %s224_s30 = scalar_lea.vmem %s848_s5, %s652_s27 }
  0x40   : > { %278 = vrot.lane.b32.xlu1 %v277_v17, %s705_s6  ;;  %282 = vrot.lane.b32.xlu0 %v266_v15, %s705_s6  ;;  %v497_v17 = vsub.s32 2, %v748_v4 }
  0x86   : > { %v288_v19 = vpop.permute.xlu1 %287  ;;  %v324_v20 = vpop.permute.xlu0 %323 }
  0x8a   : > { %v301_v21 = vpop.permute.xlu0 %300  ;;  %v328_v22 = vpop.permute.xlu1 %327 }
  0x8b   : > { %v394_v23 = vsel %vm332_vm1, %v328_v22, 0 }
  0x8c   : > { %642 = vmatpush3.bf16.msra.mxu1 %v394_v23  ;;  %v498_v23 = vrot.slane %v229_v18, %v497_v17 }
  0x8d   : > { %643 = vmatprep.subr.bf16.mxu1 %v695_v3 }
  0x8e   : > { %v326_v24 = vpop.permute.xlu0 %325  ;;  %v290_v25 = vpop.permute.xlu1 %289 }
  0x8f   : > { %v331_v26 = vsel %vm329_vm2, %v326_v24, %v328_v22  ;;  %v330_v27 = vsel %vm329_vm2, %v324_v20, %v326_v24  ;;  %v294_v49 = vsel %vm293_vm5, %v288_v19, %v290_v25  ;;  %v489_v19 = vsub.s32 0, %v748_v4 }
  0x90   : > { %632 = vmatprep.subr.msk.bf16.mxu0 %vm332_vm1, %v331_v26  ;;  %v388_v28 = vsel %vm332_vm1, %v330_v27, 0 }
  0x91   : > { %407 = vmatpush1.bf16.msra.mxu0 %v388_v28 }
  0x92   : > { %v292_v29 = vpop.permute.xlu0 %291  ;;  %v299_v30 = vpop.permute.xlu1 %298 }
  0x93   : > { %v295_v35 = vsel %vm293_vm5, %v290_v25, %v292_v29  ;;  %v304_v36 = vsel %vm302_vm3, %v299_v30, %v301_v21  ;;  %v367_v38 = vsel %vm332_vm1, %v292_v29, %v301_v21  ;;  %v493_v21 = vsub.s32 1, %v748_v4 }
  0x94   : > { %v364_v39 = vsel %vm332_vm1, %v295_v35, %v304_v36  ;;  %v490_v25 = vrot.slane %v229_v18, %v489_v19 }
  0x96   : > { %v297_v31 = vpop.permute.xlu0 %296  ;;  %v308_v32 = vpop.permute.xlu1 %307 }
  0x97   : > { %v303_v43 = vsel %vm302_vm3, %v297_v31, %v299_v30  ;;  %v494_v30 = vrot.slane %v229_v18, %v493_v21 }
  0x98   : > { %v361_v50 = vsel %vm332_vm1, %v294_v49, %v303_v43 }
  0x9a   : > { %v306_v33 = vpop.permute.xlu1 %305  ;;  %v310_v34 = vpop.permute.xlu0 %309 }
  0x9b   : > { %v313_v37 = vsel %vm311_vm4, %v308_v32, %v310_v34  ;;  %v373_v40 = vsel %vm342_vm6, %v367_v38, %v310_v34  ;;  %v312_v47 = vsel %vm311_vm4, %v306_v33, %v308_v32 }
  0x9c   : > { %v371_v46 = vsel %vm342_vm6, %v364_v39, %v313_v37  ;;  %v369_v54 = vsel %vm342_vm6, %v361_v50, %v312_v47 }
  0x9e   : > { %v319_v41 = vpop.permute.xlu1 %318  ;;  %v317_v42 = vpop.permute.xlu0 %316 }
  0x9f   : > { %v322_v44 = vsel %vm320_vm7, %v317_v42, %v319_v41  ;;  %v381_v45 = vsel %vm349_vm8, %v373_v40, %v319_v41 }
  0xa0   : > { %644 = vmatpush3.bf16.msra.mxu1 %v381_v45  ;;  %v378_v48 = vsel %vm349_vm8, %v371_v46, %v322_v44 }
  0xa1   : > { %408 = vmatprep.subr.bf16.mxu0 %v378_v48  ;;  %645 = vmatprep.subr.bf16.mxu1 %v695_v3 }
  0xa2   : > { %v260_v51 = vpop.permute.xlu1 %259  ;;  %v315_v52 = vpop.permute.xlu0 %314 }
  0xa3   : > { %v321_v53 = vsel %vm320_vm7, %v315_v52, %v317_v42 }
  0xa4   : > { %v375_v55 = vsel %vm349_vm8, %v369_v54, %v321_v53 }
  0xa5   : > { %409 = vmatpush1.bf16.msra.mxu0 %v375_v55 }
  0xa6   : > { %v258_v56 = vpop.permute.xlu1 %257  ;;  %v262_v57 = vpop.permute.xlu0 %261 }
  0xa7   : > { %v265_v60 = vsel %vm263_vm9, %v260_v51, %v262_v57  ;;  %v264_v63 = vsel %vm263_vm9, %v258_v56, %v260_v51  ;;  %v341_v3 = vsel %vm332_vm1, %v759_v10, %v262_v57 }
  0xa8   : > { %v338_v2 = vsel %vm332_vm1, %v765_v12, %v265_v60  ;;  %v335_v5 = vsel %vm332_vm1, %v755_v8, %v264_v63  ;;  %v226_v8 = vld [vmem:[%s844_s1] sm:$0xf] }
  0xaa   : > { %v273_v58 = vpop.permute.xlu1 %272  ;;  %v271_v59 = vpop.permute.xlu0 %270 }
  0xab   : > { %v276_v0 = vsel %vm274_vm10, %v271_v59, %v273_v58  ;;  %v348_v6 = vsel %vm342_vm6, %v341_v3, %v273_v58 }
  0xac   : > { %v346_v11 = vsel %vm342_vm6, %v338_v2, %v276_v0 }
  0xae   : > { %v281_v61 = vpop.permute.xlu1 %280  ;;  %v269_v62 = vpop.permute.xlu0 %268 }
  0xaf   : > { %v275_v1 = vsel %vm274_vm10, %v269_v62, %v271_v59 }
  0xb0   : > { %v344_v16 = vsel %vm342_vm6, %v335_v5, %v275_v1  ;;  %v227_v1 = vld [vmem:[%s845_s2] sm:$0xff] }
  0xb2   : > { %v279_v7 = vpop.permute.xlu1 %278  ;;  %v283_v9 = vpop.permute.xlu0 %282 }
  0xb3   : > { %v285_v13 = vsel %vm284_vm11, %v279_v7, %v281_v61  ;;  %v286_v14 = vsel %vm284_vm11, %v281_v61, %v283_v9  ;;  %v357_v15 = vsel %vm349_vm8, %v348_v6, %v283_v9  ;;  %v228_v6 = vld [vmem:[%s846_s3] sm:$0xff] }
  0xb4   : > { %646 = vmatpush3.bf16.msra.mxu1 %v357_v15  ;;  %v354_v12 = vsel %vm349_vm8, %v346_v11, %v286_v14  ;;  %v351_v10 = vsel %vm349_vm8, %v344_v16, %v285_v13 }
  0xb5   : > { %410 = vmatprep.subr.bf16.mxu0 %v354_v12 }
  0xb6   : > { %411 = vmatpush1.bf16.msra.mxu0 %v351_v10 }
  0xb7   : > { %648 = vmatmul.mubr.msk.bf16.vlgmr.msra.gmra.mxu1 %vm383_vm12, %v226_v8 }
  0xb9   : > { %633 = vmatmul.mubr.msk.bf16.vlgmr.msra.gmra.mxu0 %vm383_vm12, %v226_v8 }
 0x177   : > { %v471_v20 = vpop.f32.mrf.mxu1 }
 0x178   : > { %vm479_vm13 = vcmp.ge.f32.partialorder %v471_v20, 0.0  ;;  %v482_v22 = vmul.f32 0.01, %v471_v20 }
 0x179   : > { %v430_v24 = vpop.f32.mrf.mxu0  ;;  %v649_v26 = vpop.f32.mrf.mxu1 }
 0x17a   : > { %v485_v27 = vsel %vm479_vm13, %v471_v20, %v482_v22  ;;  %vm477_vm14 = vcmp.ge.f32.partialorder %v430_v24, 0.0  ;;  %v480_v28 = vmul.f32 0.01, %v430_v24 }
 0x17b   : > { %v432_v29 = vpop.f32.mrf.mxu0  ;;  %v474_v31 = vpop.f32.mrf.mxu1  ;;  %v821_v32 = vmul.f32 %v498_v23, %v485_v27 }
 0x17c   : > { %v483_v33 = vsel %vm477_vm14, %v430_v24, %v480_v28  ;;  %vm478_vm15 = vcmp.ge.f32.partialorder %v432_v29, 0.0  ;;  %v481_v34 = vmul.f32 0.01, %v432_v29 }
 0x17d   : > { %v502_v35 = vmul.f32 %v490_v25, %v483_v33  ;;  %v434_v36 = vpop.f32.mrf.mxu0  ;;  %v650_v4 = vpop.f32.mrf.mxu1  ;;  %v520_v40 = vmul.f32 %v821_v32, %v821_v32  ;;  %v507_v44 = vsel %vm506_vm0, %v821_v32, 0.0 }
 0x17e   : > { %v484_v37 = vsel %vm478_vm15, %v432_v29, %v481_v34 }
 0x17f   : > { %v503_v38 = vmul.f32 %v494_v30, %v484_v37  ;;  %v435_v39 = vpop.f32.mrf.mxu0  ;;  %v518_v42 = vmul.f32 %v502_v35, %v502_v35  ;;  %v522_v47 = vsel %vm506_vm0, %v520_v40, 0.0 }
 0x181   : > { %v505_v41 = vadd.f32 %v503_v38, %v502_v35  ;;  %v519_v43 = vmul.f32 %v503_v38, %v503_v38 }
 0x183   : > { %v508_v45 = vadd.f32 %v507_v44, %v505_v41  ;;  %v521_v46 = vadd.f32 %v519_v43, %v518_v42 }
 0x185   : > { %509 = vadd.xlane.f32.xlu0 %v508_v45  ;;  %v523_v48 = vadd.f32 %v522_v47, %v521_v46 }
 0x187   : > { %524 = vadd.xlane.f32.xlu1 %v523_v48 }
 0x20e   : > { %v510_v49 = vpop.xlane.xlu0 %509 }
 0x20f   : > { %v511_v50 = vrot.slane %v510_v49, 4 }
 0x210   : > { %v525_v51 = vpop.xlane.xlu1 %524 }
 0x211   : > { %v512_v52 = vadd.f32 %v511_v50, %v510_v49  ;;  %v526_v53 = vrot.slane %v525_v51, 4 }
 0x213   : > { %v513_v54 = vrot.slane %v512_v52, 2  ;;  %v527_v55 = vadd.f32 %v526_v53, %v525_v51 }
 0x215   : > { %v528_v56 = vrot.slane %v527_v55, 2  ;;  %v514_v57 = vadd.f32 %v513_v54, %v512_v52 }
 0x217   : > { %v515_v58 = vrot.slane %v514_v57, 1  ;;  %v529_v59 = vadd.f32 %v528_v56, %v527_v55 }
 0x219   : > { %v516_v60 = vadd.f32 %v515_v58, %v514_v57  ;;  %v530_v61 = vrot.slane %v529_v59, 1 }
 0x21b   : > { %653 = vpush %v516_v60  ;;  %v531_v62 = vadd.f32 %v530_v61, %v529_v59 }
 0x21d   : > { %655 = vpush %v531_v62 }
 0x24c   : > { %s654_s11 = spop %653 }
 0x24d   : > { %s535_s12 = smul.f32 0.00048828125, %s654_s11 }
 0x24e   : > { %s656_s13 = spop %655 }
 0x24f   : > { %s539_s14 = smul.f32 %s535_s12, %s535_s12  ;;  %v548_v5 = vstv %s535_s12 }
 0x250   : > { %s538_s15 = smul.f32 0.00048828125, %s656_s13 }
 0x252   : > { %s540_s16 = ssub.f32 %s538_s15, %s539_s14 }
 0x254   : > { %s541_s20 = smax.f32 %s706_s17, %s540_s16 }
 0x255   : > { %s542_s21 = sadd.f32 1e-05, %s541_s20 }
 0x257   : > { %v543_v63 = vstv %s542_s21 }
 0x258   : > { %684 = vrsqrt.f32 %v543_v63 }
 0x265   : > { %v685_v0 = vpop.eup %684 }
 0x266   : > { %657 = vpush %v685_v0 }
 0x297   : > { %s658_s24 = spop %657 }
 0x298   : > { %v546_v2 = vstv %s658_s24 }
 0x299   : > { %v547_v3 = vmul.f32 %v546_v2, %v227_v1 }
 0x29b   : > { %v549_v7 = vmul.f32 %v548_v5, %v547_v3  ;;  %553 = vperm.xlu0 %680, %v547_v3  }
 0x29d   : > { %v550_v9 = vsub.f32 %v228_v6, %v549_v7 }
 0x29f   : > { %561 = vperm.xlu1 %681, %v550_v9  }
 0x316   : > { %v554_v11 = vpop.permute.xlu0 %553 }
 0x317   : > { %v556_v13 = vmul.f32 %v554_v11, %v502_v35  ;;  %v557_v14 = vmul.f32 %v554_v11, %v503_v38  ;;  %v558_v15 = vmul.f32 %v554_v11, %v821_v32 }
 0x31a   : > { %v562_v16 = vpop.permute.xlu1 %561 }
 0x31b   : > { %v564_v12 = vadd.f32 %v562_v16, %v556_v13  ;;  %v565_v10 = vadd.f32 %v562_v16, %v557_v14  ;;  %v566_v8 = vadd.f32 %v562_v16, %v558_v15 }
 0x31d   : > { %567 = vst [vmem:[%s224_s30] sm:$0xff] %v564_v12  ;;  %568 = vst [vmem:[%s224_s30 + $0x8] sm:$0xff] %v565_v10 }
 0x31e   : > { %569 = vst.msk [vmem:[%s224_s30 + $0x10] sm:$0xff] %vm506_vm0, %v566_v8 }
 0x31f PF: > { %s15_s18 = sadd.s32 1, %s692_s18  }
 0x320   : > { %p12_p4 = scmp.ge.s32.totalorder %s15_s18, 4  }
 0x322   :  { %14 = sbr.rel (!%p12_p4) target bundleno = 1 (0x1), region = 70 }

</bundles_post_ra>
